<compile_context>
chip_gen: v7x
topology: tpu7x:2x2x1
jax: 0.10.0
libtpu: 0.0.40
codegen_flags: <defaults>
</compile_context>

<pallas_src>
import functools

import jax
import jax.numpy as jnp
from jax.experimental import pallas as pl
from jax.experimental.pallas import tpu as pltpu


def _convlstm_cell_kernel(w_ref, p_ref, b_ref, c_ref, h_out_ref, c_out_ref,
                          *, B, HW, hid):
    # w_ref : (4*hid, Kpad)   bf16  conv weight, gate-major rows, (kh,kw,c) cols
    # p_ref : (Kpad, B*H*W)   bf16  im2col patches (transposed)
    # b_ref : (4*hid, 1)      f32   conv bias
    # c_ref : (hid,  B*H*W)   f32   current cell state
    # outs  : (B, hid, H*W)   f32   h_next, c_next

    # Single fused conv-as-matmul on the MXU, f32 accumulation.
    acc = jnp.dot(w_ref[...], p_ref[...], preferred_element_type=jnp.float32)
    acc = acc + b_ref[...]                       # (4*hid, M); lane-broadcast bias

    # Gate order matches torch.split(combined_conv, hidden_dim, dim=1): i,f,o,g.
    # Sublane slices at multiples of hid -> no lane movement, full-lane VPU/EUP.
    i = jax.nn.sigmoid(acc[0 * hid:1 * hid, :])
    f = jax.nn.sigmoid(acc[1 * hid:2 * hid, :])
    o = jax.nn.sigmoid(acc[2 * hid:3 * hid, :])
    g = jnp.tanh(acc[3 * hid:4 * hid, :])

    c_cur = c_ref[...]                           # (hid, M)
    c_next = f * c_cur + i * g
    h_next = o * jnp.tanh(c_next)

    # Lane-dense stores: columns are ordered (b, h, w); each batch's column
    # block starts at a multiple of H*W (128-aligned here) -> unmasked vst.
    for b in range(B):
        cols = slice(b * HW, (b + 1) * HW)
        h_out_ref[b] = h_next[:, cols].astype(h_out_ref.dtype)
        c_out_ref[b] = c_next[:, cols].astype(c_out_ref.dtype)


@jax.jit
def conv_lstm_cell(x_nchw, h_nchw, c_nchw, weight_oihw, bias):
    """ConvLSTMCell.forward.  Inputs/outputs use the PyTorch NCHW layout."""
    B, _, H, W = x_nchw.shape
    hid = h_nchw.shape[1]
    out4, ctot, KH, KW = weight_oihw.shape
    assert out4 == 4 * hid
    # PyTorch uses padding = (KH//2, KW//2); identical to "SAME" for odd kernels.
    ph, pw = KH // 2, KW // 2
    M = B * H * W
    K = KH * KW * ctot
    Kpad = ((K + 127) // 128) * 128              # zero-pad K for clean MXU tiles

    # ---- wrapper glue (layout only).
    # TODO(synk): in a multi-timestep ConvLSTM loop, keep h/c/x in this packed
    # (channels, B*H*W) layout across steps instead of converting NCHW every call.
    x = jnp.transpose(x_nchw, (0, 2, 3, 1))
    h = jnp.transpose(h_nchw, (0, 2, 3, 1))
    combined = jnp.concatenate([x, h], axis=-1)                  # (B, H, W, ctot)
    xpad = jnp.pad(combined, ((0, 0), (ph, ph), (pw, pw), (0, 0)))

    # im2col, transposed: rows = (kh, kw, cin) taps, cols = (b, h, w) positions.
    taps = []
    for kh in range(KH):
        for kw in range(KW):
            win = xpad[:, kh:kh + H, kw:kw + W, :]               # (B, H, W, ctot)
            taps.append(jnp.transpose(win, (3, 0, 1, 2)).reshape(ctot, M))
    patches = jnp.concatenate(taps, axis=0)                      # (K, M)
    patches = jnp.pad(patches, ((0, Kpad - K), (0, 0))).astype(jnp.bfloat16)

    # OIHW -> (O, KH, KW, I) -> (O, K): column ordering matches patches rows.
    w = jnp.transpose(weight_oihw, (0, 2, 3, 1)).reshape(out4, K)
    w = jnp.pad(w, ((0, 0), (0, Kpad - K))).astype(jnp.bfloat16)
    b = bias.reshape(out4, 1).astype(jnp.float32)
    c = jnp.transpose(c_nchw, (1, 0, 2, 3)).reshape(hid, M)      # (hid, M) f32

    kernel = functools.partial(_convlstm_cell_kernel, B=B, HW=H * W, hid=hid)
    vmem = pl.BlockSpec(memory_space=pltpu.MemorySpace.VMEM)
    h_pack, c_pack = pl.pallas_call(
        kernel,
        out_shape=(jax.ShapeDtypeStruct((B, hid, H * W), jnp.float32),
                   jax.ShapeDtypeStruct((B, hid, H * W), jnp.float32)),
        in_specs=[vmem, vmem, vmem, vmem],
        out_specs=(vmem, vmem),
    )(w, patches, b, c)

    # (B, hid, H*W) is already NCHW up to a free reshape.
    return h_pack.reshape(B, hid, H, W), c_pack.reshape(B, hid, H, W)


def _reference(x, h, c, weight_oihw, bias):
    """Pure-JAX f32 reference mirroring the PyTorch module (NCHW)."""
    combined = jnp.concatenate([x, h], axis=1)
    cc = jax.lax.conv_general_dilated(
        combined, weight_oihw, window_strides=(1, 1), padding="SAME",
        dimension_numbers=("NCHW", "OIHW", "NCHW"))
    cc = cc + bias[None, :, None, None]
    cc_i, cc_f, cc_o, cc_g = jnp.split(cc, 4, axis=1)
    i = jax.nn.sigmoid(cc_i)
    f = jax.nn.sigmoid(cc_f)
    o = jax.nn.sigmoid(cc_o)
    g = jnp.tanh(cc_g)
    c_next = f * c + i * g
    h_next = o * jnp.tanh(c_next)
    return h_next, c_next


if __name__ == "__main__":
    B, Cin, hid, H, W = 2, 4, 32, 16, 16
    KH, KW = 3, 3
    ctot = Cin + hid

    key = jax.random.PRNGKey(0)
    kx, kh_, kc, kw_, kb = jax.random.split(key, 5)
    x = jax.random.normal(kx, (B, Cin, H, W), jnp.float32)
    h_cur = jax.random.normal(kh_, (B, hid, H, W), jnp.float32)
    c_cur = jax.random.normal(kc, (B, hid, H, W), jnp.float32)

    # Deterministic synthetic parameters (nn.Conv2d(ctot, 4*hid, 3, pad=1, bias=True)).
    fan_in = ctot * KH * KW
    bound = 1.0 / (fan_in ** 0.5)
    weight = jax.random.uniform(kw_, (4 * hid, ctot, KH, KW), jnp.float32,
                                minval=-bound, maxval=bound)
    bias = jax.random.uniform(kb, (4 * hid,), jnp.float32,
                              minval=-bound, maxval=bound)

    h_next, c_next = conv_lstm_cell(x, h_cur, c_cur, weight, bias)
    jax.block_until_ready((h_next, c_next))

    h_ref, c_ref = _reference(x, h_cur, c_cur, weight, bias)
    assert h_next.shape == h_ref.shape and c_next.shape == c_ref.shape
    # bf16 MXU operands (f32 accumulation) -> relaxed tolerance vs f32 reference.
    assert jnp.allclose(h_next, h_ref, atol=3e-2, rtol=3e-2)
    assert jnp.allclose(c_next, c_ref, atol=3e-2, rtol=3e-2)

    print("KERNEL_OK")
</pallas_src>

<mosaic_0001>
module attributes {stable_mosaic.version = 11 : i64} {
  func.func @_convlstm_cell_kernel(%arg0: memref<128x384xbf16, #tpu.memory_space<vmem>>, %arg1: memref<384x512xbf16, #tpu.memory_space<vmem>>, %arg2: memref<128x1xf32, #tpu.memory_space<vmem>>, %arg3: memref<32x512xf32, #tpu.memory_space<vmem>>, %arg4: memref<2x32x256xf32, #tpu.memory_space<vmem>>, %arg5: memref<2x32x256xf32, #tpu.memory_space<vmem>>) attributes {dimension_semantics = [], scalar_prefetch = 0 : i64, scratch_operands = 0 : i64, tpu.core_type = #tpu.core_type<tc>} {
    %c0 = arith.constant 0 : index
    %c0_0 = arith.constant 0 : index
    %0 = vector.load %arg0[%c0, %c0_0] : memref<128x384xbf16, #tpu.memory_space<vmem>>, vector<128x384xbf16>
    %c0_1 = arith.constant 0 : index
    %c0_2 = arith.constant 0 : index
    %1 = vector.load %arg1[%c0_1, %c0_2] : memref<384x512xbf16, #tpu.memory_space<vmem>>, vector<384x512xbf16>
    %cst = arith.constant dense<0.000000e+00> : vector<128x512xf32>
    %2 = tpu.matmul %0, %1, %cst {dimension_numbers = #tpu.dot_dimension_numbers<[1], [0], [0], [1], [0, 0, 1, 1], [], []>} : vector<128x384xbf16>, vector<384x512xbf16>, vector<128x512xf32> -> vector<128x512xf32>
    %c0_3 = arith.constant 0 : index
    %c0_4 = arith.constant 0 : index
    %3 = vector.load %arg2[%c0_3, %c0_4] : memref<128x1xf32, #tpu.memory_space<vmem>>, vector<128x1xf32>
    %4 = vector.broadcast %3 : vector<128x1xf32> to vector<128x512xf32>
    %5 = arith.addf %2, %4 : vector<128x512xf32>
    %6 = vector.extract_strided_slice %5 {offsets = [0, 0], sizes = [32, 512], strides = [1, 1]} : vector<128x512xf32> to vector<32x512xf32>
    %7 = arith.negf %6 : vector<32x512xf32>
    %8 = math.exp %7 : vector<32x512xf32>
    %cst_5 = arith.constant 1.000000e+00 : f32
    %9 = vector.broadcast %cst_5 : f32 to vector<32x512xf32>
    %10 = arith.addf %9, %8 : vector<32x512xf32>
    %11 = arith.divf %9, %10 : vector<32x512xf32>
    %12 = vector.extract_strided_slice %5 {offsets = [32, 0], sizes = [32, 512], strides = [1, 1]} : vector<128x512xf32> to vector<32x512xf32>
    %13 = arith.negf %12 : vector<32x512xf32>
    %14 = math.exp %13 : vector<32x512xf32>
    %cst_6 = arith.constant 1.000000e+00 : f32
    %15 = vector.broadcast %cst_6 : f32 to vector<32x512xf32>
    %16 = arith.addf %15, %14 : vector<32x512xf32>
    %17 = arith.divf %15, %16 : vector<32x512xf32>
    %18 = vector.extract_strided_slice %5 {offsets = [64, 0], sizes = [32, 512], strides = [1, 1]} : vector<128x512xf32> to vector<32x512xf32>
    %19 = arith.negf %18 : vector<32x512xf32>
    %20 = math.exp %19 : vector<32x512xf32>
    %cst_7 = arith.constant 1.000000e+00 : f32
    %21 = vector.broadcast %cst_7 : f32 to vector<32x512xf32>
    %22 = arith.addf %21, %20 : vector<32x512xf32>
    %23 = arith.divf %21, %22 : vector<32x512xf32>
    %24 = vector.extract_strided_slice %5 {offsets = [96, 0], sizes = [32, 512], strides = [1, 1]} : vector<128x512xf32> to vector<32x512xf32>
    %25 = math.tanh %24 : vector<32x512xf32>
    %c0_8 = arith.constant 0 : index
    %c0_9 = arith.constant 0 : index
    %26 = vector.load %arg3[%c0_8, %c0_9] : memref<32x512xf32, #tpu.memory_space<vmem>>, vector<32x512xf32>
    %27 = arith.mulf %17, %26 : vector<32x512xf32>
    %28 = arith.mulf %11, %25 : vector<32x512xf32>
    %29 = arith.addf %27, %28 : vector<32x512xf32>
    %30 = math.tanh %29 : vector<32x512xf32>
    %31 = arith.mulf %23, %30 : vector<32x512xf32>
    %32 = vector.extract_strided_slice %31 {offsets = [0, 0], sizes = [32, 256], strides = [1, 1]} : vector<32x512xf32> to vector<32x256xf32>
    %c0_10 = arith.constant 0 : index
    %c0_11 = arith.constant 0 : index
    %c0_12 = arith.constant 0 : index
    %33 = vector.load %arg4[%c0_10, %c0_11, %c0_12] : memref<2x32x256xf32, #tpu.memory_space<vmem>>, vector<1x32x256xf32>
    %34 = vector.shape_cast %33 : vector<1x32x256xf32> to vector<32x256xf32>
    %35 = vector.shape_cast %32 : vector<32x256xf32> to vector<1x32x256xf32>
    tpu.vector_store %arg4[%c0_10, %c0_11, %c0_12], %35 {strides = array<i32>} : memref<2x32x256xf32, #tpu.memory_space<vmem>>, vector<1x32x256xf32>,
    %36 = vector.extract_strided_slice %29 {offsets = [0, 0], sizes = [32, 256], strides = [1, 1]} : vector<32x512xf32> to vector<32x256xf32>
    %c0_13 = arith.constant 0 : index
    %c0_14 = arith.constant 0 : index
    %c0_15 = arith.constant 0 : index
    %37 = vector.load %arg5[%c0_13, %c0_14, %c0_15] : memref<2x32x256xf32, #tpu.memory_space<vmem>>, vector<1x32x256xf32>
    %38 = vector.shape_cast %37 : vector<1x32x256xf32> to vector<32x256xf32>
    %39 = vector.shape_cast %36 : vector<32x256xf32> to vector<1x32x256xf32>
    tpu.vector_store %arg5[%c0_13, %c0_14, %c0_15], %39 {strides = array<i32>} : memref<2x32x256xf32, #tpu.memory_space<vmem>>, vector<1x32x256xf32>,
    %40 = vector.extract_strided_slice %31 {offsets = [0, 256], sizes = [32, 256], strides = [1, 1]} : vector<32x512xf32> to vector<32x256xf32>
    %c1 = arith.constant 1 : index
    %c0_16 = arith.constant 0 : index
    %c0_17 = arith.constant 0 : index
    %41 = vector.load %arg4[%c1, %c0_16, %c0_17] : memref<2x32x256xf32, #tpu.memory_space<vmem>>, vector<1x32x256xf32>
    %42 = vector.shape_cast %41 : vector<1x32x256xf32> to vector<32x256xf32>
    %43 = vector.shape_cast %40 : vector<32x256xf32> to vector<1x32x256xf32>
    tpu.vector_store %arg4[%c1, %c0_16, %c0_17], %43 {strides = array<i32>} : memref<2x32x256xf32, #tpu.memory_space<vmem>>, vector<1x32x256xf32>,
    %44 = vector.extract_strided_slice %29 {offsets = [0, 256], sizes = [32, 256], strides = [1, 1]} : vector<32x512xf32> to vector<32x256xf32>
    %c1_18 = arith.constant 1 : index
    %c0_19 = arith.constant 0 : index
    %c0_20 = arith.constant 0 : index
    %45 = vector.load %arg5[%c1_18, %c0_19, %c0_20] : memref<2x32x256xf32, #tpu.memory_space<vmem>>, vector<1x32x256xf32>
    %46 = vector.shape_cast %45 : vector<1x32x256xf32> to vector<32x256xf32>
    %47 = vector.shape_cast %44 : vector<32x256xf32> to vector<1x32x256xf32>
    tpu.vector_store %arg5[%c1_18, %c0_19, %c0_20], %47 {strides = array<i32>} : memref<2x32x256xf32, #tpu.memory_space<vmem>>, vector<1x32x256xf32>,
    return
  }
}

</mosaic_0001>

<bundles_post_ra>
// kernel: conv_lstm_cell.1
= control target key start
LH: loop header
LB: loop body
LE: loop exit
PB: predicated region body
PF: predicated region fallthrough
CT: control target
= control target key end

     0   :  { %v2493_v1 = vmov 0   ;;  %s3355_s1 = inlined_call_operand.vmem [shape: bf16[384,512], index: 1, kind: input, shape index: {}]   ;;  %s3356_s0 = inlined_call_operand.vmem [shape: bf16[128,384], index: 0, kind: input, shape index: {}]   ;;  %s3357_s2 = inlined_call_operand.vmem [shape: f32[128,1], index: 2, kind: input, shape index: {}]   ;;  %s3358_s3 = inlined_call_operand.vmem [shape: f32[32,512], index: 3, kind: input, shape index: {}]   ;;  %s3359_s5 = inlined_call_operand.vmem [shape: f32[2,32,256], index: 5, kind: output, shape index: {1}]   ;;  %s3360_s4 = inlined_call_operand.vmem [shape: f32[2,32,256], index: 4, kind: output, shape index: {0}]  }
   0x1   :  { %v2061_v0 = vld [vmem:[%s3355_s1 + $0x4] ss:$16 sps:$4 sm:$0xff]   ;;  %2059 = vset.pattern.permute.xlu0 %v2493_v1  ;;  %2060 = vset.pattern.permute.xlu1 %v2493_v1  ;;  %v2063_v2 = vld [vmem:[%s3355_s1 + $0xc] ss:$16 sps:$4 sm:$0xff]   ;;  %v2065_v3 = vld [vmem:[%s3355_s1] ss:$16 sps:$4 sm:$0xff]  }
   0x2   :  { %852 = vmatprep.subr.bf16.mxu0 %v2061_v0  ;;  %v2066_v4 = vld [vmem:[%s3355_s1 + $0x8] ss:$16 sps:$4 sm:$0xff]   ;;  %1078 = vmatprep.subr.bf16.mxu1 %v2063_v2  ;;  %v2067_v5 = vld [vmem:[%s3355_s1 + $0x24] ss:$16 sps:$4 sm:$0xff]   ;;  %v2069_v6 = vld [vmem:[%s3355_s1 + $0x2c] ss:$16 sps:$4 sm:$0xff]  }
   0x3   :  { %853 = vmatpush1.bf16.msra.mxu0 %v2065_v3  ;;  %1079 = vmatpush1.bf16.msra.mxu1 %v2066_v4  ;;  %v2071_v7 = vld [vmem:[%s3355_s1 + $0x20] ss:$16 sps:$4 sm:$0xff]   ;;  %v2072_v8 = vld [vmem:[%s3355_s1 + $0x28] ss:$16 sps:$4 sm:$0xff]   ;;  %v2073_v9 = vld [vmem:[%s3355_s1 + $0x44] ss:$16 sps:$4 sm:$0xff]  }
   0x4   :  { %854 = vmatprep.subr.bf16.mxu0 %v2067_v5  ;;  %1080 = vmatprep.subr.bf16.mxu1 %v2069_v6  ;;  %v2075_v10 = vld [vmem:[%s3355_s1 + $0x4c] ss:$16 sps:$4 sm:$0xff]   ;;  %v2077_v11 = vld [vmem:[%s3355_s1 + $0x40] ss:$16 sps:$4 sm:$0xff]   ;;  %v2078_v12 = vld [vmem:[%s3355_s1 + $0x48] ss:$16 sps:$4 sm:$0xff]  }
   0x5   :  { %v2079_v13 = vld [vmem:[%s3355_s1 + $0x64] ss:$16 sps:$4 sm:$0xff]   ;;  %v2081_v14 = vld [vmem:[%s3355_s1 + $0x6c] ss:$16 sps:$4 sm:$0xff]   ;;  %v2083_v15 = vld [vmem:[%s3355_s1 + $0x60] ss:$16 sps:$4 sm:$0xff]  }
   0x6   :  { %v2084_v16 = vld [vmem:[%s3355_s1 + $0x68] ss:$16 sps:$4 sm:$0xff]   ;;  %v2085_v17 = vld [vmem:[%s3355_s1 + $0x84] ss:$16 sps:$4 sm:$0xff]   ;;  %v2087_v18 = vld [vmem:[%s3355_s1 + $0x8c] ss:$16 sps:$4 sm:$0xff]  }
   0x7   :  { %855 = vmatpush1.bf16.msra.mxu0 %v2071_v7  ;;  %1081 = vmatpush1.bf16.msra.mxu1 %v2072_v8  ;;  %v2089_v19 = vld [vmem:[%s3355_s1 + $0x80] ss:$16 sps:$4 sm:$0xff]   ;;  %v2090_v20 = vld [vmem:[%s3355_s1 + $0x88] ss:$16 sps:$4 sm:$0xff]   ;;  %v2091_v21 = vld [vmem:[%s3355_s1 + $0xa4] ss:$16 sps:$4 sm:$0xff]  }
   0x8   :  { %856 = vmatprep.subr.bf16.mxu0 %v2073_v9  ;;  %1082 = vmatprep.subr.bf16.mxu1 %v2075_v10  ;;  %v2093_v22 = vld [vmem:[%s3355_s1 + $0xac] ss:$16 sps:$4 sm:$0xff]   ;;  %v2095_v23 = vld [vmem:[%s3355_s1 + $0xa0] ss:$16 sps:$4 sm:$0xff]   ;;  %v2096_v24 = vld [vmem:[%s3355_s1 + $0xa8] ss:$16 sps:$4 sm:$0xff]  }
   0x9   :  { %v2097_v25 = vld [vmem:[%s3355_s1 + $0xc4] ss:$16 sps:$4 sm:$0xff]   ;;  %v2099_v26 = vld [vmem:[%s3355_s1 + $0xcc] ss:$16 sps:$4 sm:$0xff]   ;;  %v2101_v27 = vld [vmem:[%s3355_s1 + $0xc0] ss:$16 sps:$4 sm:$0xff]  }
   0xa   :  { %v2102_v28 = vld [vmem:[%s3355_s1 + $0xc8] ss:$16 sps:$4 sm:$0xff]   ;;  %v2103_v29 = vld [vmem:[%s3355_s1 + $0xe4] ss:$16 sps:$4 sm:$0xff]   ;;  %v2105_v30 = vld [vmem:[%s3355_s1 + $0xec] ss:$16 sps:$4 sm:$0xff]  }
   0xb   :  { %857 = vmatpush1.bf16.msra.mxu0 %v2077_v11  ;;  %1083 = vmatpush1.bf16.msra.mxu1 %v2078_v12  ;;  %v2107_v31 = vld [vmem:[%s3355_s1 + $0xe0] ss:$16 sps:$4 sm:$0xff]   ;;  %v2108_v32 = vld [vmem:[%s3355_s1 + $0xe8] ss:$16 sps:$4 sm:$0xff]   ;;  %v2109_v33 = vld [vmem:[%s3355_s1 + $0x104] ss:$16 sps:$4 sm:$0xff]  }
   0xc   :  { %858 = vmatprep.subr.bf16.mxu0 %v2079_v13  ;;  %1084 = vmatprep.subr.bf16.mxu1 %v2081_v14  ;;  %v2111_v34 = vld [vmem:[%s3355_s1 + $0x10c] ss:$16 sps:$4 sm:$0xff]   ;;  %v2113_v35 = vld [vmem:[%s3355_s1 + $0x100] ss:$16 sps:$4 sm:$0xff]   ;;  %v2114_v36 = vld [vmem:[%s3355_s1 + $0x108] ss:$16 sps:$4 sm:$0xff]  }
   0xd   :  { %v2115_v37 = vld [vmem:[%s3355_s1 + $0x124] ss:$16 sps:$4 sm:$0xff]   ;;  %v2117_v38 = vld [vmem:[%s3355_s1 + $0x12c] ss:$16 sps:$4 sm:$0xff]   ;;  %v2119_v39 = vld [vmem:[%s3355_s1 + $0x120] ss:$16 sps:$4 sm:$0xff]  }
   0xe   :  { %v2120_v40 = vld [vmem:[%s3355_s1 + $0x128] ss:$16 sps:$4 sm:$0xff]   ;;  %v2121_v41 = vld [vmem:[%s3355_s1 + $0x144] ss:$16 sps:$4 sm:$0xff]   ;;  %v2123_v42 = vld [vmem:[%s3355_s1 + $0x14c] ss:$16 sps:$4 sm:$0xff]  }
   0xf   :  { %859 = vmatpush1.bf16.msra.mxu0 %v2083_v15  ;;  %1085 = vmatpush1.bf16.msra.mxu1 %v2084_v16  ;;  %v2125_v43 = vld [vmem:[%s3355_s1 + $0x140] ss:$16 sps:$4 sm:$0xff]   ;;  %v2126_v44 = vld [vmem:[%s3355_s1 + $0x148] ss:$16 sps:$4 sm:$0xff]   ;;  %v2127_v45 = vld [vmem:[%s3355_s1 + $0x164] ss:$16 sps:$4 sm:$0xff]  }
  0x10   :  { %860 = vmatprep.subr.bf16.mxu0 %v2085_v17  ;;  %1086 = vmatprep.subr.bf16.mxu1 %v2087_v18  ;;  %v2129_v46 = vld [vmem:[%s3355_s1 + $0x16c] ss:$16 sps:$4 sm:$0xff]   ;;  %v2131_v47 = vld [vmem:[%s3355_s1 + $0x160] ss:$16 sps:$4 sm:$0xff]   ;;  %v2132_v48 = vld [vmem:[%s3355_s1 + $0x168] ss:$16 sps:$4 sm:$0xff]  }
  0x11   :  { %v2159_v49 = vld [vmem:[%s3356_s0 + $0x4] ss:$12 sps:$4 sm:$0xff]   ;;  %v2135_v51 = vld [vmem:[%s3355_s1 + $0x18c] ss:$16 sps:$4 sm:$0xff]   ;;  %v2138_v53 = vld [vmem:[%s3355_s1 + $0x188] ss:$16 sps:$4 sm:$0xff]  }
  0x12   :  { %v2133_v50 = vld [vmem:[%s3355_s1 + $0x184] ss:$16 sps:$4 sm:$0xff]   ;;  %884 = vmatprep.mubr.bf16.mxu0 %v2159_v49  ;;  %1110 = vmatprep.mubr.bf16.mxu1 %v2159_v49  ;;  %v2137_v52 = vld [vmem:[%s3355_s1 + $0x180] ss:$16 sps:$4 sm:$0xff]   ;;  %v2141_v55 = vld [vmem:[%s3355_s1 + $0x1ac] ss:$16 sps:$4 sm:$0xff]  }
  0x13   :  { %861 = vmatpush1.bf16.msra.mxu0 %v2089_v19  ;;  %1087 = vmatpush1.bf16.msra.mxu1 %v2090_v20  ;;  %v2139_v54 = vld [vmem:[%s3355_s1 + $0x1a4] ss:$16 sps:$4 sm:$0xff]   ;;  %v2143_v56 = vld [vmem:[%s3355_s1 + $0x1a0] ss:$16 sps:$4 sm:$0xff]   ;;  %v2144_v57 = vld [vmem:[%s3355_s1 + $0x1a8] ss:$16 sps:$4 sm:$0xff]  }
  0x14   :  { %862 = vmatprep.subr.bf16.mxu0 %v2091_v21  ;;  %1088 = vmatprep.subr.bf16.mxu1 %v2093_v22  ;;  %v2145_v58 = vld [vmem:[%s3355_s1 + $0x1c4] ss:$16 sps:$4 sm:$0xff]   ;;  %v2147_v59 = vld [vmem:[%s3355_s1 + $0x1cc] ss:$16 sps:$4 sm:$0xff]   ;;  %v2149_v60 = vld [vmem:[%s3355_s1 + $0x1c0] ss:$16 sps:$4 sm:$0xff]  }
  0x15   :  { %v2150_v61 = vld [vmem:[%s3355_s1 + $0x1c8] ss:$16 sps:$4 sm:$0xff]   ;;  %v2151_v62 = vld [vmem:[%s3355_s1 + $0x1e4] ss:$16 sps:$4 sm:$0xff]   ;;  %v2153_v63 = vld [vmem:[%s3355_s1 + $0x1ec] ss:$16 sps:$4 sm:$0xff]  }
  0x16   :  { %v2155_v0 = vld [vmem:[%s3355_s1 + $0x1e0] ss:$16 sps:$4 sm:$0xff]   ;;  %v2156_v2 = vld [vmem:[%s3355_s1 + $0x1e8] ss:$16 sps:$4 sm:$0xff]   ;;  %v2162_v3 = vld [vmem:[%s3355_s1 + $0x204] ss:$16 sps:$4 sm:$0xff]  }
  0x17   :  { %863 = vmatpush1.bf16.msra.mxu0 %v2095_v23  ;;  %1089 = vmatpush1.bf16.msra.mxu1 %v2096_v24  ;;  %v2165_v4 = vld [vmem:[%s3355_s1 + $0x20c] ss:$16 sps:$4 sm:$0xff]   ;;  %v2160_v6 = vld [vmem:[%s3355_s1 + $0x200] ss:$16 sps:$4 sm:$0xff]   ;;  %v2163_v7 = vld [vmem:[%s3355_s1 + $0x208] ss:$16 sps:$4 sm:$0xff]  }
  0x18   :  { %864 = vmatprep.subr.bf16.mxu0 %v2097_v25  ;;  %1090 = vmatprep.subr.bf16.mxu1 %v2099_v26  ;;  %v2157_v5 = vld [vmem:[%s3356_s0] ss:$12 sps:$4 sm:$0xff]   ;;  %v2166_v8 = vld [vmem:[%s3356_s0 + $0x1c] ss:$12 sps:$4 sm:$0xff]   ;;  %v2171_v9 = vld [vmem:[%s3355_s1 + $0x224] ss:$16 sps:$4 sm:$0xff]  }
  0x19   :  { %v2174_v10 = vld [vmem:[%s3355_s1 + $0x22c] ss:$16 sps:$4 sm:$0xff]   ;;  %v2169_v11 = vld [vmem:[%s3355_s1 + $0x220] ss:$16 sps:$4 sm:$0xff]   ;;  %v2172_v12 = vld [vmem:[%s3355_s1 + $0x228] ss:$16 sps:$4 sm:$0xff]  }
  0x1a   :  { %v2180_v13 = vld [vmem:[%s3355_s1 + $0x244] ss:$16 sps:$4 sm:$0xff]   ;;  %v2183_v14 = vld [vmem:[%s3355_s1 + $0x24c] ss:$16 sps:$4 sm:$0xff]   ;;  %v2178_v17 = vld [vmem:[%s3355_s1 + $0x240] ss:$16 sps:$4 sm:$0xff]  }
  0x1b   :  { %865 = vmatpush1.bf16.msra.mxu0 %v2101_v27  ;;  %1091 = vmatpush1.bf16.msra.mxu1 %v2102_v28  ;;  %v2168_v15 = vld [vmem:[%s3356_s0 + $0x18] ss:$12 sps:$4 sm:$0xff]   ;;  %v2175_v16 = vld [vmem:[%s3356_s0 + $0x34] ss:$12 sps:$4 sm:$0xff]   ;;  %v2192_v20 = vld [vmem:[%s3355_s1 + $0x26c] ss:$16 sps:$4 sm:$0xff]  }
  0x1c   :  { %866 = vmatprep.subr.bf16.mxu0 %v2103_v29  ;;  %1092 = vmatprep.subr.bf16.mxu1 %v2105_v30  ;;  %v2181_v18 = vld [vmem:[%s3355_s1 + $0x248] ss:$16 sps:$4 sm:$0xff]   ;;  %v2189_v19 = vld [vmem:[%s3355_s1 + $0x264] ss:$16 sps:$4 sm:$0xff]   ;;  %v2187_v21 = vld [vmem:[%s3355_s1 + $0x260] ss:$16 sps:$4 sm:$0xff]  }
  0x1d   :  { %v2190_v22 = vld [vmem:[%s3355_s1 + $0x268] ss:$16 sps:$4 sm:$0xff]   ;;  %v2177_v23 = vld [vmem:[%s3356_s0 + $0x30] ss:$12 sps:$4 sm:$0xff]   ;;  %v2198_v24 = vld [vmem:[%s3355_s1 + $0x284] ss:$16 sps:$4 sm:$0xff]  }
  0x1e   :  { %v2201_v25 = vld [vmem:[%s3355_s1 + $0x28c] ss:$16 sps:$4 sm:$0xff]   ;;  %v2196_v27 = vld [vmem:[%s3355_s1 + $0x280] ss:$16 sps:$4 sm:$0xff]   ;;  %v2199_v28 = vld [vmem:[%s3355_s1 + $0x288] ss:$16 sps:$4 sm:$0xff]  }
  0x1f   :  { %867 = vmatpush1.bf16.msra.mxu0 %v2107_v31  ;;  %1093 = vmatpush1.bf16.msra.mxu1 %v2108_v32  ;;  %v2184_v26 = vld [vmem:[%s3356_s0 + $0x4c] ss:$12 sps:$4 sm:$0xff]   ;;  %v2207_v29 = vld [vmem:[%s3355_s1 + $0x2a4] ss:$16 sps:$4 sm:$0xff]  }
  0x20   :  { %868 = vmatprep.subr.bf16.mxu0 %v2109_v33  ;;  %1094 = vmatprep.subr.bf16.mxu1 %v2111_v34  ;;  %v2210_v30 = vld [vmem:[%s3355_s1 + $0x2ac] ss:$16 sps:$4 sm:$0xff]   ;;  %v148_v31 = vld [vmem:[%s3357_s2] sm:$0xff]  ;;  %v150_v32 = vld [vmem:[%s3357_s2 + $0x10] sm:$0xff] }
  0x21   :  { %v2205_v33 = vld [vmem:[%s3355_s1 + $0x2a0] ss:$16 sps:$4 sm:$0xff]   ;;  %v2208_v34 = vld [vmem:[%s3355_s1 + $0x2a8] ss:$16 sps:$4 sm:$0xff]   ;;  %166 = vperm.xlu0 %2059, %v148_v31   ;;  %176 = vperm.xlu1 %2060, %v150_v32  }
  0x22   :  { %v153_v49 = vld [vmem:[%s3357_s2 + $0x28] sm:$0xff] }
  0x23   :  { %869 = vmatpush1.bf16.msra.mxu0 %v2113_v35  ;;  %1095 = vmatpush1.bf16.msra.mxu1 %v2114_v36  ;;  %v2216_v35 = vld [vmem:[%s3355_s1 + $0x2c4] ss:$16 sps:$4 sm:$0xff]   ;;  %v2219_v36 = vld [vmem:[%s3355_s1 + $0x2cc] ss:$16 sps:$4 sm:$0xff]  }
  0x24   :  { %870 = vmatprep.subr.bf16.mxu0 %v2115_v37  ;;  %1096 = vmatprep.subr.bf16.mxu1 %v2117_v38  ;;  %v2186_v37 = vld [vmem:[%s3356_s0 + $0x48] ss:$12 sps:$4 sm:$0xff]   ;;  %v2193_v38 = vld [vmem:[%s3356_s0 + $0x64] ss:$12 sps:$4 sm:$0xff]  }
  0x27   :  { %871 = vmatpush1.bf16.msra.mxu0 %v2119_v39  ;;  %1097 = vmatpush1.bf16.msra.mxu1 %v2120_v40  ;;  %v2214_v39 = vld [vmem:[%s3355_s1 + $0x2c0] ss:$16 sps:$4 sm:$0xff]   ;;  %v2217_v40 = vld [vmem:[%s3355_s1 + $0x2c8] ss:$16 sps:$4 sm:$0xff]  }
  0x28   :  { %872 = vmatprep.subr.bf16.mxu0 %v2121_v41  ;;  %1098 = vmatprep.subr.bf16.mxu1 %v2123_v42  ;;  %v2225_v41 = vld [vmem:[%s3355_s1 + $0x2e4] ss:$16 sps:$4 sm:$0xff]   ;;  %v2228_v42 = vld [vmem:[%s3355_s1 + $0x2ec] ss:$16 sps:$4 sm:$0xff]  }
  0x2b   :  { %873 = vmatpush1.bf16.msra.mxu0 %v2125_v43  ;;  %1099 = vmatpush1.bf16.msra.mxu1 %v2126_v44  ;;  %v149_v43 = vld [vmem:[%s3357_s2 + $0x8] sm:$0xff]  ;;  %v151_v44 = vld [vmem:[%s3357_s2 + $0x18] sm:$0xff] }
  0x2c   :  { %874 = vmatprep.subr.bf16.mxu0 %v2127_v45  ;;  %1100 = vmatprep.subr.bf16.mxu1 %v2129_v46  ;;  %v2223_v45 = vld [vmem:[%s3355_s1 + $0x2e0] ss:$16 sps:$4 sm:$0xff]   ;;  %v2226_v46 = vld [vmem:[%s3355_s1 + $0x2e8] ss:$16 sps:$4 sm:$0xff]  }
  0x2d   :  { %171 = vperm.xlu0 %2059, %v149_v43   ;;  %181 = vperm.xlu1 %2060, %v151_v44  }
  0x2f   :  { %875 = vmatpush1.bf16.msra.mxu0 %v2131_v47  ;;  %1101 = vmatpush1.bf16.msra.mxu1 %v2132_v48  ;;  %v2195_v47 = vld [vmem:[%s3356_s0 + $0x60] ss:$12 sps:$4 sm:$0xff]   ;;  %v2202_v48 = vld [vmem:[%s3356_s0 + $0x7c] ss:$12 sps:$4 sm:$0xff]  }
  0x30   :  { %876 = vmatprep.subr.bf16.mxu0 %v2133_v50  ;;  %1102 = vmatprep.subr.bf16.mxu1 %v2135_v51  ;;  %v152_v50 = vld [vmem:[%s3357_s2 + $0x20] sm:$0xff]  ;;  %v155_v51 = vld [vmem:[%s3357_s2 + $0x38] sm:$0xff] }
  0x31   :  { %191 = vperm.xlu1 %2060, %v153_v49   ;;  %186 = vperm.xlu0 %2059, %v152_v50  }
  0x33   :  { %877 = vmatpush1.bf16.msra.mxu0 %v2137_v52  ;;  %1103 = vmatpush1.bf16.msra.mxu1 %v2138_v53  ;;  %v154_v52 = vld [vmem:[%s3357_s2 + $0x30] sm:$0xff]  ;;  %v2204_v53 = vld [vmem:[%s3356_s0 + $0x78] ss:$12 sps:$4 sm:$0xff]  }
  0x34   :  { %878 = vmatprep.subr.bf16.mxu0 %v2139_v54  ;;  %1104 = vmatprep.subr.bf16.mxu1 %v2141_v55  ;;  %v2211_v54 = vld [vmem:[%s3356_s0 + $0x94] ss:$12 sps:$4 sm:$0xff]   ;;  %v157_v55 = vld [vmem:[%s3357_s2 + $0x48] sm:$0xff] }
  0x35   :  { %201 = vperm.xlu1 %2060, %v155_v51   ;;  %196 = vperm.xlu0 %2059, %v154_v52  }
  0x37   :  { %879 = vmatpush1.bf16.msra.mxu0 %v2143_v56  ;;  %1105 = vmatpush1.bf16.msra.mxu1 %v2144_v57  ;;  %v156_v56 = vld [vmem:[%s3357_s2 + $0x40] sm:$0xff]  ;;  %v159_v57 = vld [vmem:[%s3357_s2 + $0x58] sm:$0xff] }
  0x38   :  { %880 = vmatprep.subr.bf16.mxu0 %v2145_v58  ;;  %1106 = vmatprep.subr.bf16.mxu1 %v2147_v59  ;;  %v158_v58 = vld [vmem:[%s3357_s2 + $0x50] sm:$0xff] }
  0x39   :  { %211 = vperm.xlu1 %2060, %v157_v55   ;;  %206 = vperm.xlu0 %2059, %v156_v56   ;;  %v2213_v59 = vld [vmem:[%s3356_s0 + $0x90] ss:$12 sps:$4 sm:$0xff]  }
  0x3b   :  { %881 = vmatpush1.bf16.msra.mxu0 %v2149_v60  ;;  %1107 = vmatpush1.bf16.msra.mxu1 %v2150_v61  ;;  %v2220_v60 = vld [vmem:[%s3356_s0 + $0xac] ss:$12 sps:$4 sm:$0xff]  }
  0x3c   :  { %882 = vmatprep.subr.bf16.mxu0 %v2151_v62  ;;  %1108 = vmatprep.subr.bf16.mxu1 %v2153_v63  ;;  %v161_v61 = vld [vmem:[%s3357_s2 + $0x68] sm:$0xff]  ;;  %v160_v62 = vld [vmem:[%s3357_s2 + $0x60] sm:$0xff]  ;;  %v163_v63 = vld [vmem:[%s3357_s2 + $0x78] sm:$0xff] }
  0x3d   :  { %221 = vperm.xlu1 %2060, %v159_v57   ;;  %216 = vperm.xlu0 %2059, %v158_v58  }
  0x3f   :  { %883 = vmatpush1.bf16.msra.mxu0 %v2155_v0  ;;  %1109 = vmatpush1.bf16.msra.mxu1 %v2156_v2  ;;  %v162_v0 = vld [vmem:[%s3357_s2 + $0x70] sm:$0xff] }
  0x40   :  { %965 = vmatprep.subr.bf16.mxu0 %v2162_v3  ;;  %1191 = vmatprep.subr.bf16.mxu1 %v2165_v4  ;;  %v2222_v2 = vld [vmem:[%s3356_s0 + $0xa8] ss:$12 sps:$4 sm:$0xff]   ;;  %v2230_v4 = vld [vmem:[%s3356_s0 + $0x20] ss:$12 sps:$4 sm:$0xff]  }
  0x41   :  { %231 = vperm.xlu1 %2060, %v161_v61   ;;  %226 = vperm.xlu0 %2059, %v160_v62   ;;  %v2229_v3 = vld [vmem:[%s3356_s0 + $0x8] ss:$12 sps:$4 sm:$0xff]  }
  0x42   :  { %885 = vmatmul.mubr.bf16.vlgmr.msra.gmra.mrb[0].mxu0 %v2157_v5  ;;  %1111 = vmatmul.mubr.bf16.vlgmr.msra.gmra.mrb[0].mxu1 %v2157_v5  ;;  %v2231_v5 = vld [vmem:[%s3356_s0 + $0x38] ss:$12 sps:$4 sm:$0xff]  }
  0x43   :  { %966 = vmatpush1.bf16.msra.mxu0 %v2160_v6  ;;  %1192 = vmatpush1.bf16.msra.mxu1 %v2163_v7  ;;  %v2232_v6 = vld [vmem:[%s3356_s0 + $0x50] ss:$12 sps:$4 sm:$0xff]   ;;  %v2233_v7 = vld [vmem:[%s3356_s0 + $0x68] ss:$12 sps:$4 sm:$0xff]  }
  0x44   :  { %894 = vmatprep.mubr.bf16.mxu0 %v2166_v8  ;;  %1120 = vmatprep.mubr.bf16.mxu1 %v2166_v8  ;;  %v2234_v8 = vld [vmem:[%s3356_s0 + $0x80] ss:$12 sps:$4 sm:$0xff]  }
  0x45   :  { %967 = vmatprep.subr.bf16.mxu0 %v2171_v9  ;;  %1193 = vmatprep.subr.bf16.mxu1 %v2174_v10  ;;  %v2235_v9 = vld [vmem:[%s3356_s0 + $0x98] ss:$12 sps:$4 sm:$0xff]   ;;  %v2236_v10 = vld [vmem:[%s3356_s0 + $0xb0] ss:$12 sps:$4 sm:$0xff]  }
  0x46   :  { %241 = vperm.xlu1 %2060, %v163_v63   ;;  %236 = vperm.xlu0 %2059, %v162_v0  }
  0x47   :  { %968 = vmatpush1.bf16.msra.mxu0 %v2169_v11  ;;  %1194 = vmatpush1.bf16.msra.mxu1 %v2172_v12 }
  0x48   :  { %969 = vmatprep.subr.bf16.mxu0 %v2180_v13  ;;  %1195 = vmatprep.subr.bf16.mxu1 %v2183_v14 }
  0x4a   :  { %895 = vmatmul.mubr.bf16.gmra.mrb[4].mxu0 %v2168_v15  ;;  %1121 = vmatmul.mubr.bf16.gmra.mrb[4].mxu1 %v2168_v15 }
  0x4b   :  { %904 = vmatprep.mubr.bf16.mxu0 %v2175_v16  ;;  %1130 = vmatprep.mubr.bf16.mxu1 %v2175_v16 }
  0x4c   :  { %970 = vmatpush1.bf16.msra.mxu0 %v2178_v17  ;;  %1196 = vmatpush1.bf16.msra.mxu1 %v2181_v18 }
  0x4d   :  { %971 = vmatprep.subr.bf16.mxu0 %v2189_v19  ;;  %1197 = vmatprep.subr.bf16.mxu1 %v2192_v20 }
  0x50   :  { %972 = vmatpush1.bf16.msra.mxu0 %v2187_v21  ;;  %1198 = vmatpush1.bf16.msra.mxu1 %v2190_v22 }
  0x51   :  { %973 = vmatprep.subr.bf16.mxu0 %v2198_v24  ;;  %1199 = vmatprep.subr.bf16.mxu1 %v2201_v25 }
  0x52   :  { %905 = vmatmul.mubr.bf16.gmra.mrb[8].mxu0 %v2177_v23  ;;  %1131 = vmatmul.mubr.bf16.gmra.mrb[8].mxu1 %v2177_v23 }
  0x53   :  { %914 = vmatprep.mubr.bf16.mxu0 %v2184_v26  ;;  %1140 = vmatprep.mubr.bf16.mxu1 %v2184_v26 }
  0x54   :  { %974 = vmatpush1.bf16.msra.mxu0 %v2196_v27  ;;  %1200 = vmatpush1.bf16.msra.mxu1 %v2199_v28 }
  0x55   :  { %975 = vmatprep.subr.bf16.mxu0 %v2207_v29  ;;  %1201 = vmatprep.subr.bf16.mxu1 %v2210_v30 }
  0x58   :  { %976 = vmatpush1.bf16.msra.mxu0 %v2205_v33  ;;  %1202 = vmatpush1.bf16.msra.mxu1 %v2208_v34 }
  0x59   :  { %977 = vmatprep.subr.bf16.mxu0 %v2216_v35  ;;  %1203 = vmatprep.subr.bf16.mxu1 %v2219_v36 }
  0x5a   :  { %915 = vmatmul.mubr.bf16.gmra.mrb[12].mxu0 %v2186_v37  ;;  %1141 = vmatmul.mubr.bf16.gmra.mrb[12].mxu1 %v2186_v37 }
  0x5b   :  { %924 = vmatprep.mubr.bf16.mxu0 %v2193_v38  ;;  %1150 = vmatprep.mubr.bf16.mxu1 %v2193_v38 }
  0x5c   :  { %978 = vmatpush1.bf16.msra.mxu0 %v2214_v39  ;;  %1204 = vmatpush1.bf16.msra.mxu1 %v2217_v40 }
  0x5d   :  { %979 = vmatprep.subr.bf16.mxu0 %v2225_v41  ;;  %1205 = vmatprep.subr.bf16.mxu1 %v2228_v42 }
  0x60   :  { %980 = vmatpush1.bf16.msra.mxu0 %v2223_v45  ;;  %1206 = vmatpush1.bf16.msra.mxu1 %v2226_v46 }
  0x62   :  { %925 = vmatmul.mubr.bf16.gmra.mrb[16].mxu0 %v2195_v47  ;;  %1151 = vmatmul.mubr.bf16.gmra.mrb[16].mxu1 %v2195_v47 }
  0x63   :  { %934 = vmatprep.mubr.bf16.mxu0 %v2202_v48  ;;  %1160 = vmatprep.mubr.bf16.mxu1 %v2202_v48 }
  0x6a   :  { %935 = vmatmul.mubr.bf16.gmra.mrb[20].mxu0 %v2204_v53  ;;  %1161 = vmatmul.mubr.bf16.gmra.mrb[20].mxu1 %v2204_v53 }
  0x6b   :  { %944 = vmatprep.mubr.bf16.mxu0 %v2211_v54  ;;  %1170 = vmatprep.mubr.bf16.mxu1 %v2211_v54 }
  0x72   :  { %945 = vmatmul.mubr.bf16.gmra.mrb[24].mxu0 %v2213_v59  ;;  %1171 = vmatmul.mubr.bf16.gmra.mrb[24].mxu1 %v2213_v59 }
  0x73   :  { %954 = vmatprep.mubr.bf16.mxu0 %v2220_v60  ;;  %1180 = vmatprep.mubr.bf16.mxu1 %v2220_v60 }
  0x7a   :  { %955 = vmatmul.mubr.bf16.gmra.mrb[28].mxu0 %v2222_v2  ;;  %1181 = vmatmul.mubr.bf16.gmra.mrb[28].mxu1 %v2222_v2 }
  0x7b   :  { %997 = vmatprep.mubr.bf16.mxu0 %v2493_v1  ;;  %1223 = vmatprep.mubr.bf16.mxu1 %v2493_v1 }
  0x82   :  { %998 = vmatmul.mubr.bf16.vlgmr.msra.gmra.mrb[0].mxu0 %v2229_v3  ;;  %1224 = vmatmul.mubr.bf16.vlgmr.msra.gmra.mrb[0].mxu1 %v2229_v3 }
  0x83   :  { %1007 = vmatprep.mubr.bf16.mxu0 %v2493_v1  ;;  %1233 = vmatprep.mubr.bf16.mxu1 %v2493_v1 }
  0x8a   :  { %1008 = vmatmul.mubr.bf16.gmra.mrb[4].mxu0 %v2230_v4  ;;  %1234 = vmatmul.mubr.bf16.gmra.mrb[4].mxu1 %v2230_v4 }
  0x8b   :  { %1017 = vmatprep.mubr.bf16.mxu0 %v2493_v1  ;;  %1243 = vmatprep.mubr.bf16.mxu1 %v2493_v1 }
  0x92   :  { %1018 = vmatmul.mubr.bf16.gmra.mrb[8].mxu0 %v2231_v5  ;;  %1244 = vmatmul.mubr.bf16.gmra.mrb[8].mxu1 %v2231_v5 }
  0x93   :  { %1027 = vmatprep.mubr.bf16.mxu0 %v2493_v1  ;;  %1253 = vmatprep.mubr.bf16.mxu1 %v2493_v1 }
  0x9a   :  { %1028 = vmatmul.mubr.bf16.gmra.mrb[12].mxu0 %v2232_v6  ;;  %1254 = vmatmul.mubr.bf16.gmra.mrb[12].mxu1 %v2232_v6 }
  0x9b   :  { %1037 = vmatprep.mubr.bf16.mxu0 %v2493_v1  ;;  %1263 = vmatprep.mubr.bf16.mxu1 %v2493_v1 }
  0xa0   :  { %v167_v11 = vpop.permute.xlu0 %166  ;;  %v177_v34 = vpop.permute.xlu1 %176 }
  0xa2   :  { %1038 = vmatmul.mubr.bf16.gmra.mrb[16].mxu0 %v2233_v7  ;;  %1264 = vmatmul.mubr.bf16.gmra.mrb[16].mxu1 %v2233_v7 }
  0xa3   :  { %1047 = vmatprep.mubr.bf16.mxu0 %v2493_v1  ;;  %1273 = vmatprep.mubr.bf16.mxu1 %v2493_v1 }
  0xaa   :  { %1048 = vmatmul.mubr.bf16.gmra.mrb[20].mxu0 %v2234_v8  ;;  %1274 = vmatmul.mubr.bf16.gmra.mrb[20].mxu1 %v2234_v8 }
  0xab   :  { %1057 = vmatprep.mubr.bf16.mxu0 %v2493_v1  ;;  %1283 = vmatprep.mubr.bf16.mxu1 %v2493_v1 }
  0xac   :  { %v172_v12 = vpop.permute.xlu0 %171  ;;  %v182_v49 = vpop.permute.xlu1 %181 }
  0xb2   :  { %1058 = vmatmul.mubr.bf16.gmra.mrb[24].mxu0 %v2235_v9  ;;  %1284 = vmatmul.mubr.bf16.gmra.mrb[24].mxu1 %v2235_v9 }
  0xb3   :  { %1067 = vmatprep.mubr.bf16.mxu0 %v2493_v1  ;;  %1293 = vmatprep.mubr.bf16.mxu1 %v2493_v1 }
  0xba   :  { %1068 = vmatmul.mubr.bf16.gmra.mrb[28].mxu0 %v2236_v10  ;;  %1294 = vmatmul.mubr.bf16.gmra.mrb[28].mxu1 %v2236_v10 }
 0x155   :  { %v999_v13 = vpop.f32.mrb[0].mxu0  ;;  %v1225_v14 = vpop.f32.mrb[0].mxu1 }
 0x156   :  { %v1930_v15 = vadd.f32 %v999_v13, %v167_v11  ;;  %v1962_v16 = vadd.f32 %v1225_v14, %v167_v11  ;;  %v1001_v17 = vpop.f32.mrb[1].mxu0  ;;  %v1227_v18 = vpop.f32.mrb[1].mxu1 }
 0x157   :  { %v1931_v19 = vadd.f32 %v1001_v17, %v167_v11  ;;  %v1963_v20 = vadd.f32 %v1227_v18, %v167_v11  ;;  %v1003_v21 = vpop.f32.mrb[2].mxu0  ;;  %v1229_v22 = vpop.f32.mrb[2].mxu1 }
 0x158   :  { %v1866_v23 = vmul.f32 -1.442695, %v1930_v15  ;;  %v1868_v1 = vmul.f32 -1.442695, %v1962_v16  ;;  %v1932_v24 = vadd.f32 %v1003_v21, %v172_v12  ;;  %v1964_v25 = vadd.f32 %v1229_v22, %v172_v12  ;;  %v1005_v26 = vpop.f32.mrb[3].mxu0  ;;  %v1231_v27 = vpop.f32.mrb[3].mxu1 }
 0x159   :  { %v1867_v28 = vmul.f32 -1.442695, %v1931_v19  ;;  %v1869_v29 = vmul.f32 -1.442695, %v1963_v20  ;;  %v1933_v30 = vadd.f32 %v1005_v26, %v172_v12  ;;  %v1965_v31 = vadd.f32 %v1231_v27, %v172_v12  ;;  %v187_v19 = vpop.permute.xlu0 %186 }
 0x15a   :  { %2237 = vpow2.f32 %v1866_v23  ;;  %v1870_v32 = vmul.f32 -1.442695, %v1932_v24  ;;  %v1872_v33 = vmul.f32 -1.442695, %v1964_v25 }
 0x15b   :  { %2239 = vpow2.f32 %v1868_v1  ;;  %v1871_v35 = vmul.f32 -1.442695, %v1933_v30  ;;  %v1873_v36 = vmul.f32 -1.442695, %v1965_v31 }
 0x15c   :  { %2241 = vpow2.f32 %v1867_v28 }
 0x15d   :  { %2243 = vpow2.f32 %v1869_v29  ;;  %v1009_v37 = vpop.f32.mrb[4].mxu0  ;;  %v1235_v38 = vpop.f32.mrb[4].mxu1 }
 0x15e   :  { %2245 = vpow2.f32 %v1870_v32  ;;  %v1934_v39 = vadd.f32 %v1009_v37, %v177_v34  ;;  %v1011_v40 = vpop.f32.mrb[5].mxu0  ;;  %v1237_v41 = vpop.f32.mrb[5].mxu1  ;;  %v1966_v42 = vadd.f32 %v1235_v38, %v177_v34 }
 0x15f   :  { %2247 = vpow2.f32 %v1872_v33  ;;  %v1013_v43 = vpop.f32.mrb[6].mxu0  ;;  %v1239_v44 = vpop.f32.mrb[6].mxu1  ;;  %v1935_v46 = vadd.f32 %v1011_v40, %v177_v34  ;;  %v1967_v50 = vadd.f32 %v1237_v41, %v177_v34 }
 0x160   :  { %2249 = vpow2.f32 %v1871_v35  ;;  %v1874_v45 = vmul.f32 -1.442695, %v1934_v39  ;;  %v1015_v47 = vpop.f32.mrb[7].mxu0  ;;  %v1241_v48 = vpop.f32.mrb[7].mxu1  ;;  %v1936_v51 = vadd.f32 %v1013_v43, %v182_v49  ;;  %v1876_v52 = vmul.f32 -1.442695, %v1966_v42 }
 0x161   :  { %2251 = vpow2.f32 %v1873_v36  ;;  %v1875_v54 = vmul.f32 -1.442695, %v1935_v46  ;;  %v1877_v56 = vmul.f32 -1.442695, %v1967_v50  ;;  %v1968_v16 = vadd.f32 %v1239_v44, %v182_v49  ;;  %v192_v38 = vpop.permute.xlu1 %191 }
 0x162   :  { %2253 = vpow2.f32 %v1874_v45  ;;  %v1878_v60 = vmul.f32 -1.442695, %v1936_v51  ;;  %v1937_v18 = vadd.f32 %v1015_v47, %v182_v49  ;;  %v1969_v22 = vadd.f32 %v1241_v48, %v182_v49 }
 0x163   :  { %2255 = vpow2.f32 %v1876_v52  ;;  %v1880_v28 = vmul.f32 -1.442695, %v1968_v16 }
 0x164   :  { %v2238_v53 = vpop.eup %2237  ;;  %2257 = vpow2.f32 %v1875_v54  ;;  %v1879_v33 = vmul.f32 -1.442695, %v1937_v18  ;;  %v1881_v37 = vmul.f32 -1.442695, %v1969_v22 }
 0x165   :  { %v2240_v55 = vpop.eup %2239  ;;  %v1019_v57 = vpop.f32.mrb[8].mxu0  ;;  %v1352_v0 = vadd.f32 1.0, %v2238_v53  ;;  %2259 = vpow2.f32 %v1877_v56 }
 0x166   :  { %v1245_v58 = vpop.f32.mrb[8].mxu1  ;;  %v2242_v59 = vpop.eup %2241  ;;  %v1354_v5 = vadd.f32 1.0, %v2240_v55  ;;  %2261 = vpow2.f32 %v1878_v60  ;;  %v1938_v25 = vadd.f32 %v1019_v57, %v187_v19 }
 0x167   :  { %v1021_v61 = vpop.f32.mrb[9].mxu0  ;;  %v1247_v62 = vpop.f32.mrb[9].mxu1  ;;  %v1353_v8 = vadd.f32 1.0, %v2242_v59  ;;  %2263 = vrcp.f32 %v1352_v0  ;;  %v1970_v29 = vadd.f32 %v1245_v58, %v187_v19 }
 0x168   :  { %v2244_v63 = vpop.eup %2243  ;;  %v1023_v2 = vpop.f32.mrb[10].mxu0  ;;  %2265 = vrcp.f32 %v1354_v5  ;;  %v1939_v34 = vadd.f32 %v1021_v61, %v187_v19  ;;  %v1971_v39 = vadd.f32 %v1247_v62, %v187_v19  ;;  %v1882_v41 = vmul.f32 -1.442695, %v1938_v25 }
 0x169   :  { %v1249_v3 = vpop.f32.mrb[10].mxu1  ;;  %v2246_v4 = vpop.eup %2245  ;;  %v1355_v11 = vadd.f32 1.0, %v2244_v63  ;;  %2267 = vrcp.f32 %v1353_v8  ;;  %v1940_v42 = vadd.f32 %v1023_v2, %v192_v38  ;;  %v1884_v44 = vmul.f32 -1.442695, %v1970_v29 }
 0x16a   :  { %v2950_v6 = vpop.f32.mrb[11].mxu0  ;;  %v2248_v7 = vpop.eup %2247  ;;  %v1356_v13 = vadd.f32 1.0, %v2246_v4  ;;  %v1972_v45 = vadd.f32 %v1249_v3, %v192_v38  ;;  %v1883_v47 = vmul.f32 -1.442695, %v1939_v34  ;;  %v1885_v51 = vmul.f32 -1.442695, %v1971_v39 }
 0x16b   :  { %v2952_v9 = vpop.f32.mrb[11].mxu1  ;;  %v2250_v10 = vpop.eup %2249  ;;  %v1358_v15 = vadd.f32 1.0, %v2248_v7  ;;  %2269 = vrcp.f32 %v1355_v11  ;;  %v1886_v55 = vmul.f32 -1.442695, %v1940_v42  ;;  %v1941_v0 = vadd.f32 %v2950_v6, %v192_v38 }
 0x16c   :  { %v2252_v12 = vpop.eup %2251  ;;  %v1357_v17 = vadd.f32 1.0, %v2250_v10  ;;  %2271 = vrcp.f32 %v1356_v13  ;;  %v1888_v59 = vmul.f32 -1.442695, %v1972_v45  ;;  %v197_v4 = vpop.permute.xlu0 %196  ;;  %v1973_v5 = vadd.f32 %v2952_v9, %v192_v38 }
 0x16d   :  { %v2254_v14 = vpop.eup %2253  ;;  %v2954_v20 = vpop.f32.mrb[12].mxu0  ;;  %v1359_v21 = vadd.f32 1.0, %v2252_v12  ;;  %2273 = vrcp.f32 %v1358_v15 }
 0x16e   :  { %v2956_v23 = vpop.f32.mrb[12].mxu1  ;;  %v2958_v1 = vpop.f32.mrb[13].mxu0  ;;  %v1360_v24 = vadd.f32 1.0, %v2254_v14  ;;  %2275 = vrcp.f32 %v1357_v17  ;;  %v1942_v10 = vadd.f32 %v2954_v20, %v197_v4  ;;  %v1887_v14 = vmul.f32 -1.442695, %v1941_v0 }
 0x16f   :  { %v2960_v26 = vpop.f32.mrb[13].mxu1  ;;  %v2962_v27 = vpop.f32.mrb[14].mxu0  ;;  %2277 = vrcp.f32 %v1359_v21  ;;  %v1974_v13 = vadd.f32 %v2956_v23, %v197_v4  ;;  %v1889_v17 = vmul.f32 -1.442695, %v1973_v5 }
 0x170   :  { %v2964_v30 = vpop.f32.mrb[14].mxu1  ;;  %v2966_v31 = vpop.f32.mrb[15].mxu0  ;;  %2279 = vrcp.f32 %v1360_v24  ;;  %v1890_v21 = vmul.f32 -1.442695, %v1942_v10 }
 0x171   :  { %v2256_v32 = vpop.eup %2255  ;;  %v2968_v35 = vpop.f32.mrb[15].mxu1  ;;  %2281 = vpow2.f32 %v1880_v28  ;;  %v1892_v25 = vmul.f32 -1.442695, %v1974_v13 }
 0x172   :  { %v2258_v36 = vpop.eup %2257  ;;  %2283 = vpow2.f32 %v1879_v33  ;;  %v1362_v63 = vadd.f32 1.0, %v2256_v32  ;;  %v202_v42 = vpop.permute.xlu1 %201 }
 0x173   :  { %v2260_v40 = vpop.eup %2259  ;;  %2285 = vpow2.f32 %v1881_v37  ;;  %v1361_v3 = vadd.f32 1.0, %v2258_v36 }
 0x174   :  { %v2262_v43 = vpop.eup %2261  ;;  %2287 = vpow2.f32 %v1882_v41  ;;  %v1363_v8 = vadd.f32 1.0, %v2260_v40 }
 0x175   :  { %v2970_v46 = vpop.eup %2263  ;;  %v2972_v48 = vpop.f32.mrb[16].mxu0  ;;  %2289 = vpow2.f32 %v1884_v44  ;;  %v1364_v12 = vadd.f32 1.0, %v2262_v43 }
 0x176   :  { %v2974_v49 = vpop.f32.mrb[16].mxu1  ;;  %v2976_v50 = vpop.eup %2265  ;;  %2291 = vpow2.f32 %v1883_v47 }
 0x177   :  { %v2978_v52 = vpop.f32.mrb[17].mxu0  ;;  %v2980_v53 = vpop.f32.mrb[17].mxu1  ;;  %2293 = vpow2.f32 %v1885_v51  ;;  %v1943_v51 = vadd.f32 %v2958_v1, %v197_v4  ;;  %v1944_v1 = vadd.f32 %v2962_v27, %v202_v42 }
 0x178   :  { %v2982_v54 = vpop.eup %2267  ;;  %v2984_v56 = vpop.f32.mrb[18].mxu0  ;;  %2295 = vpow2.f32 %v1886_v55 }
 0x179   :  { %v2986_v57 = vpop.f32.mrb[18].mxu1  ;;  %v2988_v58 = vpop.eup %2269  ;;  %2297 = vpow2.f32 %v1888_v59 }
 0x17a   :  { %v2990_v60 = vpop.f32.mrb[19].mxu0  ;;  %v2992_v61 = vpop.f32.mrb[19].mxu1  ;;  %2299 = vrcp.f32 %v1362_v63 }
 0x17b   :  { %v2994_v62 = vpop.eup %2271  ;;  %2301 = vrcp.f32 %v1361_v3  ;;  %v1975_v3 = vadd.f32 %v2960_v26, %v197_v4  ;;  %v1976_v26 = vadd.f32 %v2964_v30, %v202_v42  ;;  %v207_v27 = vpop.permute.xlu0 %206 }
 0x17c   :  { %v2997_v2 = vpop.eup %2273  ;;  %2303 = vrcp.f32 %v1363_v8 }
 0x17d   :  { %v3000_v7 = vpop.eup %2275  ;;  %v3008_v15 = vpop.f32.mrb[20].mxu0  ;;  %2305 = vrcp.f32 %v1364_v12 }
 0x17e   :  { %v3003_v11 = vpop.eup %2277  ;;  %v3010_v16 = vpop.f32.mrb[20].mxu1  ;;  %2307 = vpow2.f32 %v1887_v14 }
 0x17f   :  { %v3006_v6 = vpop.eup %2279  ;;  %v3012_v18 = vpop.f32.mrb[21].mxu0  ;;  %2309 = vpow2.f32 %v1889_v17 }
 0x180   :  { %v2282_v9 = vpop.eup %2281  ;;  %v3014_v19 = vpop.f32.mrb[21].mxu1  ;;  %2311 = vpow2.f32 %v1890_v21  ;;  %v1891_v21 = vmul.f32 -1.442695, %v1943_v51 }
 0x181   :  { %v2284_v20 = vpop.eup %2283  ;;  %v3016_v22 = vpop.f32.mrb[22].mxu0  ;;  %v1366_v32 = vadd.f32 1.0, %v2282_v9  ;;  %2313 = vpow2.f32 %v1892_v25 }
 0x182   :  { %v3018_v23 = vpop.f32.mrb[22].mxu1  ;;  %v2286_v24 = vpop.eup %2285  ;;  %v1365_v36 = vadd.f32 1.0, %v2284_v20 }
 0x183   :  { %v3020_v28 = vpop.f32.mrb[23].mxu0  ;;  %v2288_v29 = vpop.eup %2287  ;;  %v1367_v38 = vadd.f32 1.0, %v2286_v24  ;;  %2315 = vrcp.f32 %v1366_v32  ;;  %v1945_v24 = vadd.f32 %v2966_v31, %v202_v42  ;;  %v1977_v32 = vadd.f32 %v2968_v35, %v202_v42 }
 0x184   :  { %v3022_v33 = vpop.f32.mrb[23].mxu1  ;;  %v2290_v34 = vpop.eup %2289  ;;  %v1448_v40 = vadd.f32 1.0, %v2288_v29  ;;  %2317 = vrcp.f32 %v1365_v36  ;;  %v1893_v29 = vmul.f32 -1.442695, %v1975_v3  ;;  %v1894_v36 = vmul.f32 -1.442695, %v1944_v1 }
 0x185   :  { %v2292_v37 = vpop.eup %2291  ;;  %v1450_v43 = vadd.f32 1.0, %v2290_v34  ;;  %v3024_v44 = vpop.f32.mrb[24].mxu0  ;;  %2319 = vrcp.f32 %v1367_v38  ;;  %v1896_v38 = vmul.f32 -1.442695, %v1976_v26 }
 0x186   :  { %v2294_v39 = vpop.eup %2293  ;;  %v1449_v47 = vadd.f32 1.0, %v2292_v37  ;;  %v3027_v55 = vpop.f32.mrb[24].mxu1  ;;  %2321 = vrcp.f32 %v1448_v40  ;;  %v1946_v37 = vadd.f32 %v2972_v48, %v207_v27  ;;  %v1897_v48 = vmul.f32 -1.442695, %v1977_v32 }
 0x187   :  { %v2296_v41 = vpop.eup %2295  ;;  %v3029_v59 = vpop.f32.mrb[25].mxu0  ;;  %v1451_v0 = vadd.f32 1.0, %v2294_v39  ;;  %2323 = vrcp.f32 %v1450_v43  ;;  %v1978_v39 = vadd.f32 %v2974_v49, %v207_v27  ;;  %v1895_v43 = vmul.f32 -1.442695, %v1945_v24 }
 0x188   :  { %v2298_v45 = vpop.eup %2297  ;;  %v3034_v5 = vpop.f32.mrb[25].mxu1  ;;  %v1452_v12 = vadd.f32 1.0, %v2296_v41  ;;  %2325 = vrcp.f32 %v1449_v47  ;;  %v1898_v3 = vmul.f32 -1.442695, %v1946_v37 }
 0x189   :  { %v3031_v63 = vpop.eup %2299  ;;  %v3036_v8 = vpop.f32.mrb[26].mxu0  ;;  %v1454_v17 = vadd.f32 1.0, %v2298_v45  ;;  %2327 = vrcp.f32 %v1451_v0  ;;  %v1947_v45 = vadd.f32 %v2978_v52, %v207_v27 }
 0x18a   :  { %v3038_v10 = vpop.eup %2301  ;;  %v3041_v13 = vpop.f32.mrb[26].mxu1  ;;  %2329 = vrcp.f32 %v1452_v12 }
 0x18b   :  { %v3043_v14 = vpop.f32.mrb[27].mxu0  ;;  %v3045_v9 = vpop.eup %2303  ;;  %2331 = vrcp.f32 %v1454_v17  ;;  %v1900_v17 = vmul.f32 -1.442695, %v1978_v39 }
 0x18c   :  { %3361 = vst [vmem:[#allocation2_spill] sm:$0xff] %v3045_v9  ;;  %v3048_v4 = vpop.f32.mrb[27].mxu1  ;;  %v3050_v20 = vpop.eup %2305  ;;  %2333 = vpow2.f32 %v1891_v21  ;;  %v1899_v21 = vmul.f32 -1.442695, %v1947_v45 }
 0x18d   :  { %3362 = vst [vmem:[#allocation3_spill] sm:$0xff] %v3050_v20  ;;  %v2308_v25 = vpop.eup %2307  ;;  %v3056_v40 = vpop.f32.mrb[28].mxu0  ;;  %2335 = vpow2.f32 %v1893_v29 }
 0x18e   :  { %v2310_v34 = vpop.eup %2309  ;;  %v3058_v41 = vpop.f32.mrb[28].mxu1  ;;  %2337 = vpow2.f32 %v1894_v36  ;;  %v1453_v29 = vadd.f32 1.0, %v2308_v25  ;;  %v1979_v36 = vadd.f32 %v2980_v53, %v207_v27 }
 0x18f   :  { %v2312_v30 = vpop.eup %2311  ;;  %v3061_v35 = vpop.f32.mrb[29].mxu0  ;;  %2339 = vpow2.f32 %v1896_v38 }
 0x190   :  { %v2314_v31 = vpop.eup %2313  ;;  %v3063_v42 = vpop.f32.mrb[29].mxu1  ;;  %2341 = vpow2.f32 %v1895_v43  ;;  %v1456_v38 = vadd.f32 1.0, %v2312_v30  ;;  %v1901_v53 = vmul.f32 -1.442695, %v1979_v36 }
 0x191   :  { %v3065_v47 = vpop.eup %2315  ;;  %v3067_v51 = vpop.f32.mrb[30].mxu0  ;;  %2343 = vpow2.f32 %v1897_v48  ;;  %v1458_v45 = vadd.f32 1.0, %v2314_v31 }
 0x192   :  { %3363 = vst [vmem:[#allocation4_spill] sm:$0xff] %v3065_v47  ;;  %v3069_v49 = vpop.f32.mrb[30].mxu1  ;;  %v3071_v0 = vpop.eup %2317  ;;  %2345 = vpow2.f32 %v1898_v3 }
 0x193   :  { %3364 = vst [vmem:[#allocation5_spill] sm:$0xff] %v3071_v0  ;;  %v3073_v12 = vpop.f32.mrb[31].mxu0  ;;  %v3075_v1 = vpop.f32.mrb[31].mxu1  ;;  %v1455_v0 = vadd.f32 1.0, %v2310_v34  ;;  %2347 = vpow2.f32 %v1900_v17 }
 0x194   :  { %v3077_v52 = vpop.eup %2319  ;;  %v212_v32 = vpop.permute.xlu1 %211  ;;  %2349 = vpow2.f32 %v1899_v21 }
 0x195   :  { %3365 = vst [vmem:[#allocation6_spill] sm:$0xff] %v3077_v52  ;;  %v3079_v26 = vpop.eup %2321  ;;  %v1948_v47 = vadd.f32 %v2984_v56, %v212_v32  ;;  %v1980_v39 = vadd.f32 %v2986_v57, %v212_v32  ;;  %v1949_v25 = vadd.f32 %v2990_v60, %v212_v32  ;;  %2351 = vrcp.f32 %v1453_v29 }
 0x196   :  { %v3081_v24 = vpop.eup %2323  ;;  %2353 = vrcp.f32 %v1455_v0 }
 0x197   :  { %v3084_v37 = vpop.eup %2325  ;;  %v1902_v34 = vmul.f32 -1.442695, %v1948_v47  ;;  %2355 = vrcp.f32 %v1456_v38  ;;  %v1904_v3 = vmul.f32 -1.442695, %v1980_v39  ;;  %v1903_v17 = vmul.f32 -1.442695, %v1949_v25  ;;  %v217_v39 = vpop.permute.xlu0 %216 }
 0x198   :  { %v3087_v52 = vpop.eup %2327  ;;  %2357 = vrcp.f32 %v1458_v45  ;;  %v1981_v25 = vadd.f32 %v2992_v61, %v212_v32 }
 0x199   :  { %v3090_v43 = vpop.eup %2329  ;;  %2359 = vpow2.f32 %v1901_v53 }
 0x19a   :  { %v3093_v48 = vpop.eup %2331  ;;  %2361 = vpow2.f32 %v1902_v34  ;;  %v1950_v34 = vadd.f32 %v3008_v15, %v217_v39  ;;  %v1905_v61 = vmul.f32 -1.442695, %v1981_v25 }
 0x19b   :  { %v2334_v27 = vpop.eup %2333  ;;  %2363 = vpow2.f32 %v1904_v3 }
 0x19c   :  { %v2336_v56 = vpop.eup %2335  ;;  %v1457_v20 = vadd.f32 1.0, %v2334_v27  ;;  %2365 = vpow2.f32 %v1903_v17  ;;  %v1906_v15 = vmul.f32 -1.442695, %v1950_v34  ;;  %v227_v34 = vpop.permute.xlu0 %226 }
 0x19d   :  { %v2338_v30 = vpop.eup %2337  ;;  %v1459_v21 = vadd.f32 1.0, %v2336_v56 }
 0x19e   :  { %v2340_v57 = vpop.eup %2339  ;;  %v1460_v9 = vadd.f32 1.0, %v2338_v30  ;;  %2367 = vrcp.f32 %v1457_v20  ;;  %v1982_v30 = vadd.f32 %v3010_v16, %v217_v39 }
 0x19f   :  { %v2342_v31 = vpop.eup %2341  ;;  %v1462_v36 = vadd.f32 1.0, %v2340_v57  ;;  %2369 = vrcp.f32 %v1459_v21  ;;  %v1951_v57 = vadd.f32 %v3012_v18, %v217_v39 }
 0x1a0   :  { %v2344_v60 = vpop.eup %2343  ;;  %v1461_v47 = vadd.f32 1.0, %v2342_v31  ;;  %2371 = vrcp.f32 %v1460_v9  ;;  %v1983_v9 = vadd.f32 %v3014_v19, %v217_v39 }
 0x1a1   :  { %v2346_v29 = vpop.eup %2345  ;;  %v1463_v45 = vadd.f32 1.0, %v2344_v60  ;;  %2373 = vrcp.f32 %v1462_v36  ;;  %v1908_v60 = vmul.f32 -1.442695, %v1982_v30  ;;  %v1907_v16 = vmul.f32 -1.442695, %v1951_v57 }
 0x1a2   :  { %v2348_v0 = vpop.eup %2347  ;;  %v1544_v53 = vadd.f32 1.0, %v2346_v29  ;;  %2375 = vrcp.f32 %v1461_v47  ;;  %v1954_v57 = vadd.f32 %v3024_v44, %v227_v34  ;;  %v1987_v44 = vadd.f32 %v3034_v5, %v227_v34 }
 0x1a3   :  { %v2350_v38 = vpop.eup %2349  ;;  %v1546_v3 = vadd.f32 1.0, %v2348_v0  ;;  %2377 = vrcp.f32 %v1463_v45  ;;  %v1909_v0 = vmul.f32 -1.442695, %v1983_v9 }
 0x1a4   :  { %v3096_v27 = vpop.eup %2351  ;;  %v1545_v17 = vadd.f32 1.0, %v2350_v38  ;;  %2379 = vrcp.f32 %v1544_v53  ;;  %v222_v53 = vpop.permute.xlu1 %221 }
 0x1a5   :  { %v3099_v56 = vpop.eup %2353  ;;  %2381 = vrcp.f32 %v1546_v3  ;;  %v1984_v9 = vadd.f32 %v3018_v23, %v222_v53 }
 0x1a6   :  { %v3102_v20 = vpop.eup %2355  ;;  %2383 = vrcp.f32 %v1545_v17  ;;  %v1952_v17 = vadd.f32 %v3016_v22, %v222_v53  ;;  %v1985_v22 = vadd.f32 %v3022_v33, %v222_v53 }
 0x1a7   :  { %v3105_v31 = vpop.eup %2357  ;;  %2385 = vpow2.f32 %v1905_v61 }
 0x1a8   :  { %v2360_v32 = vpop.eup %2359  ;;  %2387 = vpow2.f32 %v1906_v15 }
 0x1a9   :  { %v2362_v21 = vpop.eup %2361  ;;  %v1547_v18 = vadd.f32 1.0, %v2360_v32  ;;  %2389 = vpow2.f32 %v1908_v60  ;;  %v1986_v32 = vadd.f32 %v3027_v55, %v227_v34  ;;  %v1955_v60 = vadd.f32 %v3029_v59, %v227_v34 }
 0x1aa   :  { %v2364_v29 = vpop.eup %2363  ;;  %v1548_v45 = vadd.f32 1.0, %v2362_v21  ;;  %2391 = vpow2.f32 %v1907_v16  ;;  %v1953_v21 = vadd.f32 %v3020_v28, %v222_v53  ;;  %v1912_v55 = vmul.f32 -1.442695, %v1984_v9  ;;  %v1608_v9 = vld [vmem:[%s3358_s3] sm:$0xff] }
 0x1ab   :  { %v2366_v36 = vpop.eup %2365  ;;  %v1550_v39 = vadd.f32 1.0, %v2364_v29  ;;  %2393 = vpow2.f32 %v1909_v0 }
 0x1ac   :  { %v3108_v47 = vpop.eup %2367  ;;  %v1549_v3 = vadd.f32 1.0, %v2366_v36  ;;  %2395 = vrcp.f32 %v1547_v18  ;;  %v1910_v36 = vmul.f32 -1.442695, %v1952_v17  ;;  %v1911_v18 = vmul.f32 -1.442695, %v1953_v21 }
 0x1ad   :  { %v3110_v38 = vpop.eup %2369  ;;  %2397 = vrcp.f32 %v1548_v45  ;;  %v1913_v45 = vmul.f32 -1.442695, %v1985_v22  ;;  %v1610_v22 = vld [vmem:[%s3358_s3 + $0x10] sm:$0xff] }
 0x1ae   :  { %v3112_v19 = vpop.eup %2371  ;;  %2399 = vrcp.f32 %v1550_v39 }
 0x1af   :  { %v3114_v25 = vpop.eup %2373  ;;  %2401 = vrcp.f32 %v1549_v3 }
 0x1b0   :  { %v3116_v30 = vpop.eup %2375  ;;  %2403 = vtanh.f32 %v1954_v57 }
 0x1b1   :  { %v3120_v61 = vpop.eup %2377  ;;  %2405 = vtanh.f32 %v1986_v32  ;;  %v232_v32 = vpop.permute.xlu1 %231 }
 0x1b2   :  { %v3124_v15 = vpop.eup %2379  ;;  %2407 = vtanh.f32 %v1955_v60 }
 0x1b3   :  { %v3128_v29 = vpop.eup %2381  ;;  %2409 = vtanh.f32 %v1987_v44  ;;  %v1956_v44 = vadd.f32 %v3036_v8, %v232_v32  ;;  %v1626_v8 = vmul.f32 %v3081_v24, %v1610_v22  ;;  %v1957_v24 = vadd.f32 %v3043_v14, %v232_v32 }
 0x1b4   :  { %v3132_v16 = vpop.eup %2383  ;;  %2411 = vpow2.f32 %v1910_v36 }
 0x1b5   :  { %v2386_v23 = vpop.eup %2385  ;;  %2413 = vpow2.f32 %v1912_v55  ;;  %v1988_v55 = vadd.f32 %v3041_v13, %v232_v32 }
 0x1b6   :  { %v2388_v0 = vpop.eup %2387  ;;  %v1551_v39 = vadd.f32 1.0, %v2386_v23  ;;  %2415 = vpow2.f32 %v1911_v18  ;;  %v1609_v23 = vld [vmem:[%s3358_s3 + $0x8] sm:$0xff]  ;;  %v1624_v18 = vmul.f32 %v3079_v26, %v1608_v9 }
 0x1b7   :  { %v2390_v28 = vpop.eup %2389  ;;  %v1552_v33 = vadd.f32 1.0, %v2388_v0  ;;  %2417 = vpow2.f32 %v1913_v45 }
 0x1b8   :  { %v2392_v59 = vpop.eup %2391  ;;  %v1554_v53 = vadd.f32 1.0, %v2390_v28  ;;  %2419 = vrcp.f32 %v1551_v39  ;;  %v1611_v28 = vld [vmem:[%s3358_s3 + $0x18] sm:$0xff] }
 0x1b9   :  { %v2394_v3 = vpop.eup %2393  ;;  %v1553_v17 = vadd.f32 1.0, %v2392_v59  ;;  %2421 = vrcp.f32 %v1552_v33  ;;  %v1625_v33 = vmul.f32 %v3084_v37, %v1609_v23  ;;  %v1627_v9 = vmul.f32 %v3087_v52, %v1611_v28 }
 0x1ba   :  { %v3134_v5 = vpop.eup %2395  ;;  %v1555_v21 = vadd.f32 1.0, %v2394_v3  ;;  %2423 = vrcp.f32 %v1554_v53 }
 0x1bb   :  { %v3136_v34 = vpop.eup %2397  ;;  %2425 = vrcp.f32 %v1553_v17 }
 0x1bc   :  { %v3138_v57 = vpop.eup %2399  ;;  %2427 = vrcp.f32 %v1555_v21  ;;  %v237_v21 = vpop.permute.xlu0 %236 }
 0x1bd   :  { %v3143_v60 = vpop.eup %2401  ;;  %2429 = vtanh.f32 %v1956_v44  ;;  %v1958_v22 = vadd.f32 %v3056_v40, %v237_v21  ;;  %v1991_v40 = vadd.f32 %v3063_v42, %v237_v21 }
 0x1be   :  { %3366 = vst [vmem:[#allocation7_spill] sm:$0xff] %v3143_v60  ;;  %v2404_v36 = vpop.eup %2403  ;;  %2431 = vtanh.f32 %v1988_v55  ;;  %v1612_v55 = vld [vmem:[%s3358_s3 + $0x20] sm:$0xff] }
 0x1bf   :  { %v2406_v0 = vpop.eup %2405  ;;  %v1640_v45 = vmul.f32 %v2404_v36, %v2970_v46  ;;  %v242_v36 = vpop.permute.xlu1 %241 }
 0x1c0   :  { %v2408_v59 = vpop.eup %2407  ;;  %v1642_v39 = vmul.f32 %v2406_v0, %v2976_v50  ;;  %v1961_v42 = vadd.f32 %v3073_v12, %v242_v36 }
 0x1c1   :  { %v2410_v3 = vpop.eup %2409  ;;  %v1656_v13 = vadd.f32 %v1640_v45, %v1624_v18  ;;  %v1641_v53 = vmul.f32 %v2408_v59, %v2982_v54  ;;  %v1992_v18 = vadd.f32 %v3069_v49, %v242_v36  ;;  %v1628_v59 = vmul.f32 %v3090_v43, %v1612_v55  ;;  %v1613_v43 = vld [vmem:[%s3358_s3 + $0x28] sm:$0xff]  ;;  %v1620_v55 = vld [vmem:[%s3358_s3 + $0x60] sm:$0xff] }
 0x1c2   :  { %v2412_v26 = vpop.eup %2411  ;;  %v1658_v60 = vadd.f32 %v1642_v39, %v1626_v8  ;;  %v1643_v17 = vmul.f32 %v2410_v3, %v2988_v58  ;;  %v1989_v58 = vadd.f32 %v3048_v4, %v232_v32  ;;  %v1959_v4 = vadd.f32 %v3061_v35, %v237_v21  ;;  %v1614_v35 = vld [vmem:[%s3358_s3 + $0x30] sm:$0xff] }
 0x1c3   :  { %v2414_v46 = vpop.eup %2413  ;;  %2433 = vtanh.f32 %v1656_v13  ;;  %1712 = vst [vmem:[%s3359_s5] sm:$0xff] %v1656_v13  ;;  %v1657_v50 = vadd.f32 %v1641_v53, %v1625_v33  ;;  %v1630_v39 = vmul.f32 %v3093_v48, %v1614_v35  ;;  %v1993_v53 = vadd.f32 %v3075_v1, %v242_v36 }
 0x1c4   :  { %v2416_v37 = vpop.eup %2415  ;;  %2435 = vtanh.f32 %v1658_v60  ;;  %1922 = vst [vmem:[%s3359_s5 + $0x40] sm:$0xff] %v1658_v60  ;;  %v1659_v54 = vadd.f32 %v1643_v17, %v1627_v9  ;;  %v1990_v60 = vadd.f32 %v3058_v41, %v237_v21  ;;  %v1960_v41 = vadd.f32 %v3067_v51, %v242_v36  ;;  %v1618_v21 = vld [vmem:[%s3358_s3 + $0x50] sm:$0xff] }
 0x1c5   :  { %v3172_v52 = vpop.eup %2417  ;;  %2437 = vtanh.f32 %v1657_v50  ;;  %1713 = vst [vmem:[%s3359_s5 + $0x8] sm:$0xff] %v1657_v50  ;;  %v1557_v50 = vadd.f32 1.0, %v2416_v37 }
 0x1c6   :  { %v3178_v14 = vpop.eup %2419  ;;  %2439 = vtanh.f32 %v1659_v54  ;;  %1923 = vst [vmem:[%s3359_s5 + $0x48] sm:$0xff] %v1659_v54 }
 0x1c7   :  { %v3184_v44 = vpop.eup %2421  ;;  %2441 = vtanh.f32 %v1957_v24  ;;  %v1629_v24 = vmul.f32 %v3096_v27, %v1613_v43  ;;  %v1623_v43 = vld [vmem:[%s3358_s3 + $0x78] sm:$0xff] }
 0x1c8   :  { %v3187_v32 = vpop.eup %2423  ;;  %2443 = vtanh.f32 %v1989_v58  ;;  %v1617_v58 = vld [vmem:[%s3358_s3 + $0x48] sm:$0xff] }
 0x1c9   :  { %v3190_v23 = vpop.eup %2425  ;;  %2445 = vtanh.f32 %v1958_v22  ;;  %v1633_v35 = vmul.f32 %v3108_v47, %v1617_v58 }
 0x1ca   :  { %v3196_v0 = vpop.eup %2427  ;;  %2447 = vtanh.f32 %v1990_v60 }
 0x1cb   :  { %v2430_v28 = vpop.eup %2429  ;;  %2449 = vtanh.f32 %v1959_v4 }
 0x1cc   :  { %v2432_v45 = vpop.eup %2431  ;;  %v1644_v8 = vmul.f32 %v2430_v28, %v2994_v62  ;;  %2451 = vtanh.f32 %v1991_v40  ;;  %v1556_v62 = vadd.f32 1.0, %v2412_v26  ;;  %v1616_v26 = vld [vmem:[%s3358_s3 + $0x40] sm:$0xff]  ;;  %v1634_v40 = vmul.f32 %v3105_v31, %v1618_v21  ;;  %v3372_v21 = vld [vmem:[#allocation7_spill] sm:$0xff] }
 0x1cd   :  { %v2434_v51 = vpop.eup %2433  ;;  %v1646_v3 = vmul.f32 %v2432_v45, %v2997_v2  ;;  %2453 = vtanh.f32 %v1960_v41  ;;  %v1615_v2 = vld [vmem:[%s3358_s3 + $0x38] sm:$0xff]  ;;  %v1632_v60 = vmul.f32 %v3102_v20, %v1616_v26  ;;  %v3367_v45 = vld [vmem:[#allocation2_spill] sm:$0xff] }
 0x1ce   :  { %v2436_v33 = vpop.eup %2435  ;;  %v1688_v13 = vmul.f32 %v2434_v51, %v3124_v15  ;;  %v1660_v49 = vadd.f32 %v1644_v8, %v1628_v59  ;;  %2455 = vtanh.f32 %v1992_v18  ;;  %v1558_v15 = vadd.f32 1.0, %v2414_v46  ;;  %v1622_v18 = vld [vmem:[%s3358_s3 + $0x70] sm:$0xff] }
 0x1cf   :  { %v2438_v12 = vpop.eup %2437  ;;  %v1690_v9 = vmul.f32 %v2436_v33, %v3128_v29  ;;  %v1662_v17 = vadd.f32 %v1646_v3, %v1630_v39  ;;  %2457 = vtanh.f32 %v1961_v42  ;;  %v1631_v54 = vmul.f32 %v3099_v56, %v1615_v2 }
 0x1d0   :  { %v2440_v48 = vpop.eup %2439  ;;  %1704 = vst [vmem:[%s3360_s4] sm:$0xff] %v1688_v13  ;;  %v1689_v1 = vmul.f32 %v2438_v12, %v3132_v16  ;;  %2459 = vtanh.f32 %v1660_v49  ;;  %1714 = vst [vmem:[%s3359_s5 + $0x10] sm:$0xff] %v1660_v49  ;;  %v1636_v51 = vmul.f32 %v3112_v19, %v1620_v55  ;;  %v1638_v33 = vmul.f32 %v3114_v25, %v1622_v18  ;;  %v3369_v49 = vld [vmem:[#allocation4_spill] sm:$0xff] }
 0x1d1   :  { %v2442_v29 = vpop.eup %2441  ;;  %1914 = vst [vmem:[%s3360_s4 + $0x40] sm:$0xff] %v1690_v9  ;;  %v1691_v46 = vmul.f32 %v2440_v48, %v3134_v5  ;;  %2461 = vtanh.f32 %v1662_v17  ;;  %1924 = vst [vmem:[%s3359_s5 + $0x50] sm:$0xff] %v1662_v17 }
 0x1d2   :  { %v2444_v16 = vpop.eup %2443  ;;  %1705 = vst [vmem:[%s3360_s4 + $0x8] sm:$0xff] %v1689_v1  ;;  %v1645_v37 = vmul.f32 %v2442_v29, %v3000_v7  ;;  %2463 = vtanh.f32 %v1993_v53  ;;  %v1619_v7 = vld [vmem:[%s3358_s3 + $0x58] sm:$0xff] }
 0x1d3   :  { %v2446_v5 = vpop.eup %2445  ;;  %2465 = vrcp.f32 %v1556_v62  ;;  %1915 = vst [vmem:[%s3360_s4 + $0x48] sm:$0xff] %v1691_v46  ;;  %v1647_v27 = vmul.f32 %v2444_v16, %v3003_v11  ;;  %v1635_v42 = vmul.f32 %v3110_v38, %v1619_v7  ;;  %v3368_v38 = vld [vmem:[#allocation3_spill] sm:$0xff]  ;;  %v3370_v62 = vld [vmem:[#allocation5_spill] sm:$0xff] }
 0x1d4   :  { %v2448_v22 = vpop.eup %2447  ;;  %2467 = vrcp.f32 %v1558_v15  ;;  %v1661_v56 = vadd.f32 %v1645_v37, %v1629_v24  ;;  %v1648_v4 = vmul.f32 %v2446_v5, %v3006_v6  ;;  %v1559_v15 = vadd.f32 1.0, %v3172_v52  ;;  %v3371_v52 = vld [vmem:[#allocation6_spill] sm:$0xff] }
 0x1d5   :  { %v2450_v36 = vpop.eup %2449  ;;  %2469 = vrcp.f32 %v1557_v50  ;;  %v1663_v11 = vadd.f32 %v1647_v27, %v1631_v54  ;;  %v1650_v41 = vmul.f32 %v2448_v22, %v3031_v63  ;;  %v1621_v63 = vld [vmem:[%s3358_s3 + $0x68] sm:$0xff] }
 0x1d6   :  { %v2452_v20 = vpop.eup %2451  ;;  %2471 = vtanh.f32 %v1661_v56  ;;  %1715 = vst [vmem:[%s3359_s5 + $0x18] sm:$0xff] %v1661_v56  ;;  %v1664_v6 = vadd.f32 %v1648_v4, %v1632_v60  ;;  %v1649_v31 = vmul.f32 %v2450_v36, %v3038_v10  ;;  %v1637_v12 = vmul.f32 %v3116_v30, %v1621_v63 }
 0x1d7   :  { %v2454_v28 = vpop.eup %2453  ;;  %2473 = vtanh.f32 %v1663_v11  ;;  %1925 = vst [vmem:[%s3359_s5 + $0x58] sm:$0xff] %v1663_v11  ;;  %v1666_v47 = vadd.f32 %v1650_v41, %v1634_v40  ;;  %v1651_v59 = vmul.f32 %v2452_v20, %v3367_v45 }
 0x1d8   :  { %v2456_v8 = vpop.eup %2455  ;;  %2475 = vtanh.f32 %v1664_v6  ;;  %1716 = vst [vmem:[%s3359_s5 + $0x20] sm:$0xff] %v1664_v6  ;;  %v1665_v10 = vadd.f32 %v1649_v31, %v1633_v35  ;;  %v1652_v39 = vmul.f32 %v2454_v28, %v3368_v38 }
 0x1d9   :  { %v2458_v3 = vpop.eup %2457  ;;  %2477 = vtanh.f32 %v1666_v47  ;;  %1926 = vst [vmem:[%s3359_s5 + $0x60] sm:$0xff] %v1666_v47  ;;  %v1667_v13 = vadd.f32 %v1651_v59, %v1635_v42  ;;  %v1654_v53 = vmul.f32 %v2456_v8, %v3369_v49 }
 0x1da   :  { %v2460_v19 = vpop.eup %2459  ;;  %2479 = vtanh.f32 %v1665_v10  ;;  %1717 = vst [vmem:[%s3359_s5 + $0x28] sm:$0xff] %v1665_v10  ;;  %v1668_v25 = vadd.f32 %v1652_v39, %v1636_v51  ;;  %v1653_v9 = vmul.f32 %v2458_v3, %v3370_v62 }
 0x1db   :  { %v2462_v17 = vpop.eup %2461  ;;  %v1692_v48 = vmul.f32 %v2460_v19, %v3136_v34  ;;  %2481 = vtanh.f32 %v1667_v13  ;;  %1927 = vst [vmem:[%s3359_s5 + $0x68] sm:$0xff] %v1667_v13  ;;  %v1670_v30 = vadd.f32 %v1654_v53, %v1638_v33  ;;  %v1639_v34 = vmul.f32 %v3120_v61, %v1623_v43 }
 0x1dc   :  { %v2464_v2 = vpop.eup %2463  ;;  %v1694_v1 = vmul.f32 %v2462_v17, %v3138_v57  ;;  %2483 = vtanh.f32 %v1668_v25  ;;  %1718 = vst [vmem:[%s3359_s5 + $0x30] sm:$0xff] %v1668_v25  ;;  %v1669_v29 = vadd.f32 %v1653_v9, %v1637_v12 }
 0x1dd   :  { %v2466_v26 = vpop.eup %2465  ;;  %1706 = vst [vmem:[%s3360_s4 + $0x10] sm:$0xff] %v1692_v48  ;;  %2485 = vtanh.f32 %v1670_v30  ;;  %1928 = vst [vmem:[%s3359_s5 + $0x70] sm:$0xff] %v1670_v30  ;;  %v1655_v57 = vmul.f32 %v2464_v2, %v3371_v52 }
 0x1de   :  { %v2468_v50 = vpop.eup %2467  ;;  %1916 = vst [vmem:[%s3360_s4 + $0x50] sm:$0xff] %v1694_v1  ;;  %2487 = vtanh.f32 %v1669_v29  ;;  %1719 = vst [vmem:[%s3359_s5 + $0x38] sm:$0xff] %v1669_v29 }
 0x1df   :  { %v2470_v61 = vpop.eup %2469  ;;  %v1671_v46 = vadd.f32 %v1655_v57, %v1639_v34  ;;  %2489 = vrcp.f32 %v1559_v15 }
 0x1e0   :  { %v2472_v16 = vpop.eup %2471 }
 0x1e1   :  { %v2474_v24 = vpop.eup %2473  ;;  %v1693_v37 = vmul.f32 %v2472_v16, %v3372_v21  ;;  %2491 = vtanh.f32 %v1671_v46  ;;  %1929 = vst [vmem:[%s3359_s5 + $0x78] sm:$0xff] %v1671_v46 }
 0x1e2   :  { %v2476_v5 = vpop.eup %2475  ;;  %v1695_v54 = vmul.f32 %v2474_v24, %v3178_v14 }
 0x1e3   :  { %v2478_v58 = vpop.eup %2477  ;;  %1707 = vst [vmem:[%s3360_s4 + $0x18] sm:$0xff] %v1693_v37  ;;  %v1696_v27 = vmul.f32 %v2476_v5, %v3184_v44 }
 0x1e4   :  { %v2480_v22 = vpop.eup %2479  ;;  %1917 = vst [vmem:[%s3360_s4 + $0x58] sm:$0xff] %v1695_v54  ;;  %v1698_v60 = vmul.f32 %v2478_v58, %v3187_v32 }
 0x1e5   :  { %v2482_v7 = vpop.eup %2481  ;;  %1708 = vst [vmem:[%s3360_s4 + $0x20] sm:$0xff] %v1696_v27  ;;  %v1697_v14 = vmul.f32 %v2480_v22, %v3190_v23 }
 0x1e6   :  { %v2484_v56 = vpop.eup %2483  ;;  %1918 = vst [vmem:[%s3360_s4 + $0x60] sm:$0xff] %v1698_v60  ;;  %v1699_v44 = vmul.f32 %v2482_v7, %v3196_v0 }
 0x1e7   :  { %v2486_v4 = vpop.eup %2485  ;;  %1709 = vst [vmem:[%s3360_s4 + $0x28] sm:$0xff] %v1697_v14  ;;  %v1700_v32 = vmul.f32 %v2484_v56, %v2466_v26 }
 0x1e8   :  { %v2488_v36 = vpop.eup %2487  ;;  %1919 = vst [vmem:[%s3360_s4 + $0x68] sm:$0xff] %v1699_v44  ;;  %v1702_v40 = vmul.f32 %v2486_v4, %v2468_v50 }
 0x1e9   :  { %1710 = vst [vmem:[%s3360_s4 + $0x30] sm:$0xff] %v1700_v32  ;;  %v1701_v23 = vmul.f32 %v2488_v36, %v2470_v61  ;;  %v2490_v55 = vpop.eup %2489 }
 0x1ea   :  { %1920 = vst [vmem:[%s3360_s4 + $0x70] sm:$0xff] %v1702_v40 }
 0x1eb   :  { %v2492_v0 = vpop.eup %2491  ;;  %1711 = vst [vmem:[%s3360_s4 + $0x38] sm:$0xff] %v1701_v23 }
 0x1ec   :  { %v1703_v11 = vmul.f32 %v2492_v0, %v2490_v55 }
 0x1ee   :  { %1921 = vst [vmem:[%s3360_s4 + $0x78] sm:$0xff] %v1703_v11 }

</bundles_post_ra>
